<compile_context>
chip_gen: v7x
topology: tpu7x:2x2x1
jax: 0.10.0
libtpu: 0.0.40
codegen_flags: <defaults>
</compile_context>

<pallas_src>
import numpy as np
import jax
import jax.numpy as jnp
from jax.experimental import pallas as pl
from jax.experimental.pallas import tpu as pltpu


# --------------------------------------------------------------------------
# Pallas kernel: fused in-kernel gather + interpolate + sim_fg + sim_bg
# --------------------------------------------------------------------------
def _sim_kernel(pix_ref, bary_ref, feat_ref, fmem_ref, clut_ref, out_ref):
    # pix_ref  : (1, 1, T)           int32    pix_to_face (-1 on background)
    # bary_ref : (1, 3, T)           f32      barycentric coords, pixels on lanes
    # feat_ref : (1, C, T)           bf16/f32 forward feature, channels on sublanes
    # fmem_ref : (n_chunks, C, 3*Fc) f32      fmem[j, c, k*Fc+f] = memory[faces[j*Fc+f, k], c]
    # clut_ref : (C, 1)              f32      merged (normalized-mean) clutter feature
    # out_ref  : (1, 2, T)           f32      row 0 = sim_fg, row 1 = sim_bg
    pix = pix_ref[0]                                    # (1, T) int32
    bary = bary_ref[0]                                  # (3, T) f32
    feat = feat_ref[0]                                  # (C, T) bf16/f32 (no f32 copy)

    n_chunks = fmem_ref.shape[0]
    Fc = fmem_ref.shape[2] // 3
    T = pix.shape[1]

    face_iota = jax.lax.broadcasted_iota(jnp.int32, (Fc, T), 0)

    # interpolate_face_attributes as ONE stacked MXU matmul per face chunk:
    #   proj[c, p] = sum_{k,f} fmem[c, k*Fc+f] * (bary[k, p] if pix[p] == f else 0)
    # Background pixels (pix == -1) match no face -> projected feature is 0 there,
    # matching pytorch3d's masking.  The weighted one-hot uses one compare + three
    # selects (no astype + mul).
    # TODO(synk): for very large meshes (Fn >> 1k) an XLA pre-gather producing a
    # (B, 3*C, P) stream would beat the in-kernel one-hot (select work ~ Fn*T).
    proj = None
    for j in range(n_chunks):                           # static unroll, n_chunks small
        match = (face_iota + j * Fc) == pix             # (Fc, T) bool
        rhs = jnp.concatenate(
            [jnp.where(match, bary[0:1, :], 0.0),
             jnp.where(match, bary[1:2, :], 0.0),
             jnp.where(match, bary[2:3, :], 0.0)],
            axis=0)                                     # (3*Fc, T) f32
        contrib = jnp.dot(fmem_ref[j], rhs, preferred_element_type=jnp.float32)
        proj = contrib if proj is None else proj + contrib   # (C, T) f32

    # sim_fg: per-pixel channel dot (sublane reduce); feat promoted per-op to f32.
    out_ref[0, 0:1, :] = jnp.sum(proj * feat, axis=0, keepdims=True)
    # sim_bg: 1x1 conv == clutter-vector dot; VPU broadcast-mul + sublane reduce
    # (an M=1 MXU matmul would waste 127/128 of the MXU rows + a serial MRF pop).
    out_ref[0, 1:2, :] = jnp.sum(clut_ref[...] * feat, axis=0, keepdims=True)


def _choose_tile(P, C, Fc, n_chunks, feat_itemsize, B, max_tile=2048):
    # Largest pixel tile (multiple of 128) whose FULL VMEM working set fits
    # comfortably on v7x (64 MiB physical / 32 MiB scoped): double-buffered IO,
    # resident face memory + clutter, and in-kernel temporaries (stacked one-hot
    # RHS, f32 proj, fg/bg products, iota/mask).
    budget = 20 << 20
    resident = 2 * (n_chunks * C * 3 * Fc * 4 + C * 4)

    def est(t):
        io = 2 * t * (C * feat_itemsize       # feat block (double buffered)
                      + 3 * 4 + 4             # bary + pix
                      + 2 * 4)                # merged (2, t) f32 output
        tmp = t * 4 * (3 * Fc                 # stacked weighted one-hot RHS
                       + 3 * C                # f32 proj + fg/bg products
                       + 8)                   # iota / mask / misc
        return resident + io + tmp

    tile = max_tile
    while tile > 128 and est(tile) > budget:
        tile //= 2
    if P < tile:
        tile = ((P + 127) // 128) * 128
    # Keep >= 2 grid steps so v7x's two TensorCores both get work when possible.
    if B * ((P + tile - 1) // tile) < 2 and tile > 128:
        tile = max(128, (((P + 1) // 2 + 127) // 128) * 128)
    return max(tile, 128)


def fused_sim(pix, bary, feat, fmem_chunks, clutter_col, *, max_tile=2048):
    # pix: (B, 1, P) int32 ; bary: (B, 3, P) f32 ; feat: (B, C, P) bf16/f32
    # fmem_chunks: (n_chunks, C, 3*Fc) f32 (fully VMEM-resident)
    # clutter_col: (C, 1) f32
    B, _, P = pix.shape
    C = feat.shape[1]
    n_chunks, _, K = fmem_chunks.shape
    Fc = K // 3

    tile = _choose_tile(P, C, Fc, n_chunks, jnp.dtype(feat.dtype).itemsize, B, max_tile)
    P_pad = ((P + tile - 1) // tile) * tile
    if P_pad != P:
        padw = ((0, 0), (0, 0), (0, P_pad - P))
        pix = jnp.pad(pix, padw, constant_values=-1)    # padded pixels -> background
        bary = jnp.pad(bary, padw)
        feat = jnp.pad(feat, padw)

    grid = (B, P_pad // tile)   # both axes parallel -> shards across v7x's 2 TCs
    out = pl.pallas_call(
        _sim_kernel,
        out_shape=jax.ShapeDtypeStruct((B, 2, P_pad), jnp.float32),
        grid_spec=pltpu.PrefetchScalarGridSpec(
            num_scalar_prefetch=0,
            grid=grid,
            in_specs=[
                pl.BlockSpec((1, 1, tile), lambda b, i: (b, 0, i)),
                pl.BlockSpec((1, 3, tile), lambda b, i: (b, 0, i)),
                pl.BlockSpec((1, C, tile), lambda b, i: (b, 0, i)),
                pl.BlockSpec((n_chunks, C, K), lambda b, i: (0, 0, 0)),  # resident face memory
                pl.BlockSpec((C, 1), lambda b, i: (0, 0)),               # resident clutter
            ],
            out_specs=pl.BlockSpec((1, 2, tile), lambda b, i: (b, 0, i)),
        ),
        compiler_params=pltpu.CompilerParams(
            dimension_semantics=("parallel", "parallel"),
            vmem_limit_bytes=32 << 20),
    )(pix, bary, feat, fmem_chunks, clutter_col)
    return out[:, 0, :P], out[:, 1, :P]


# --------------------------------------------------------------------------
# Plain-JAX glue reproducing the module's non-kernel math
# --------------------------------------------------------------------------
def camera_position_from_spherical_angles(dist, elev, azim, degrees=True):
    if degrees:
        elev = elev * (np.pi / 180.0)
        azim = azim * (np.pi / 180.0)
    x = dist * jnp.cos(elev) * jnp.sin(azim)
    y = dist * jnp.sin(elev)
    z = dist * jnp.cos(elev) * jnp.cos(azim)
    return jnp.stack([x, y, z], axis=-1)  # (B, 3)


def look_at_rotation(campos, at=(0.0, 0.0, 0.0), up=(0.0, 1.0, 0.0)):
    at = jnp.broadcast_to(jnp.asarray(at, jnp.float32), campos.shape)
    up = jnp.broadcast_to(jnp.asarray(up, jnp.float32), campos.shape)

    def _norm(v):
        return v / jnp.maximum(jnp.linalg.norm(v, axis=-1, keepdims=True), 1e-5)

    z_axis = _norm(at - campos)
    x_axis = _norm(jnp.cross(up, z_axis))
    y_axis = _norm(jnp.cross(z_axis, x_axis))
    R = jnp.stack([x_axis, y_axis, z_axis], axis=1)  # rows = axes
    return jnp.transpose(R, (0, 2, 1))               # columns = axes (pytorch3d)


def rotation_theta(theta):
    theta = theta.reshape(-1, 1, 1)
    mul_ = jnp.array([[1, 0, 0, 0, 1, 0, 0, 0, 0],
                      [0, -1, 0, 1, 0, 0, 0, 0, 0]], jnp.float32).reshape(1, 2, 9)
    bia_ = jnp.array([0] * 8 + [1], jnp.float32).reshape(1, 1, 9)
    cos_sin = jnp.concatenate([jnp.cos(theta), jnp.sin(theta)], axis=2)  # (B,1,2)
    trans = jnp.matmul(cos_sin, mul_) + bia_
    return trans.reshape(-1, 3, 3)


def campos_to_R_T(campos, theta):
    R = look_at_rotation(campos)
    R = jnp.matmul(R, rotation_theta(theta))
    T = -jnp.matmul(jnp.transpose(R, (0, 2, 1)), campos[:, :, None])[:, :, 0]
    return R, T


def pre_process_mesh_pascal(verts):
    return jnp.concatenate([verts[:, 0:1], verts[:, 2:3], -verts[:, 1:2]], axis=1)


def rasterize_simple(verts, faces, R, T, image_size, fov_deg=12.0):
    # TODO(synk): pytorch3d's MeshRasterizer (z-buffered triangle rasterization with
    # exact NDC / clipping conventions) has no clean Pallas equivalent; this is a
    # brute-force JAX approximation with screen-space barycentrics and a naive depth test.
    B = R.shape[0]
    H = W = image_size
    v_view = jnp.einsum("vj,bjk->bvk", verts, R) + T[:, None, :]  # (B, V, 3)
    s = 1.0 / np.tan(np.deg2rad(fov_deg) / 2.0)
    z = v_view[..., 2]
    x_ndc = s * v_view[..., 0] / z
    y_ndc = s * v_view[..., 1] / z
    tri = jnp.stack([x_ndc, y_ndc, z], axis=-1)[:, faces]  # (B, F, 3verts, 3)

    # pixel centers in NDC (+X left, +Y up, pytorch3d-ish)
    ys = -((2.0 * (jnp.arange(H, dtype=jnp.float32) + 0.5) / H) - 1.0)
    xs = -((2.0 * (jnp.arange(W, dtype=jnp.float32) + 0.5) / W) - 1.0)
    py, px = jnp.meshgrid(ys, xs, indexing="ij")
    pix = jnp.stack([px.ravel(), py.ravel()], axis=-1)  # (P, 2)

    p0 = tri[:, :, 0, :2][:, :, None, :]  # (B, F, 1, 2)
    p1 = tri[:, :, 1, :2][:, :, None, :]
    p2 = tri[:, :, 2, :2][:, :, None, :]
    z012 = tri[:, :, :, 2]                # (B, F, 3)
    p = pix[None, None, :, :]             # (1, 1, P, 2)

    def area2(a, b, c):
        return ((b[..., 0] - a[..., 0]) * (c[..., 1] - a[..., 1])
                - (b[..., 1] - a[..., 1]) * (c[..., 0] - a[..., 0]))

    area = area2(p0, p1, p2)  # (B, F, 1)
    denom = jnp.where(jnp.abs(area) < 1e-8, 1.0, area)
    w0 = area2(p, p1, p2) / denom
    w1 = area2(p0, p, p2) / denom
    w2 = area2(p0, p1, p) / denom
    bary = jnp.stack([w0, w1, w2], axis=-1)  # (B, F, P, 3)
    inside = (w0 >= 0) & (w1 >= 0) & (w2 >= 0) & (jnp.abs(area) >= 1e-8)
    zpix = jnp.einsum("bfpk,bfk->bfp", bary, z012)
    valid = inside & (zpix > 0.0)
    zbuf = jnp.where(valid, zpix, jnp.inf)   # (B, F, P)
    best_face = jnp.argmin(zbuf, axis=1)     # (B, P)
    any_valid = jnp.any(valid, axis=1)       # (B, P)
    pix_to_face = jnp.where(any_valid, best_face.astype(jnp.int32), -1)
    bary_best = jnp.take_along_axis(bary, best_face[:, None, :, None], axis=1)[:, 0]
    bary_best = jnp.where(any_valid[..., None], bary_best, 0.0)
    return pix_to_face.reshape(B, H, W), bary_best.reshape(B, H, W, 3)


# --------------------------------------------------------------------------
# Full forward (MeshTrainingForwardModule.forward)
# --------------------------------------------------------------------------
def mesh_training_forward(forward_feature, pose, memory, verts, faces, n_points, render_size):
    # forward_feature: (B, C, H, W) NCHW (f32 or bf16), pose: (B, 4)
    B, C, Ho, Wo = forward_feature.shape
    render_image_size = max(render_size)

    # update_memory: vertex memory -> face memory, chunked & flattened to
    # (n_chunks, C, 3*Fc) so the kernel does ONE stacked MXU matmul per chunk.
    # Kept in f32 (bf16 operands would be faster on v5e's MXU but change numerics).
    face_memory = memory[:n_points][faces]                      # (Fn, 3, C)
    Fn = face_memory.shape[0]
    Fc = min(256, ((Fn + 7) // 8) * 8)                          # <=256 faces/chunk keeps the
    n_chunks = -(-Fn // Fc)                                     # (3*Fc, T) RHS temporary small
    Fp = n_chunks * Fc
    fm = jnp.transpose(face_memory, (1, 2, 0)).astype(jnp.float32)  # (3, C, Fn)
    if Fp != Fn:
        fm = jnp.pad(fm, ((0, 0), (0, 0), (0, Fp - Fn)))        # padded faces are all-zero
    fmem_chunks = jnp.transpose(fm.reshape(3, C, n_chunks, Fc),
                                (2, 1, 0, 3)).reshape(n_chunks, C, 3 * Fc)

    # clutter_merge_func: normalize(mean(memory[n_points:], dim=0)).unsqueeze(0)
    clut_mean = jnp.mean(memory[n_points:], axis=0)
    clut_norm = jnp.sqrt(jnp.sum(clut_mean ** 2))
    # tiny eps guard: reference normalize has no eps and emits inf/NaN at norm==0
    clutter_col = (clut_mean / jnp.maximum(clut_norm, 1e-12))[:, None].astype(jnp.float32)  # (C, 1)

    # decompose_pose -> camera position -> R, T
    dist, elev, azim, theta = pose[:, 0], pose[:, 1], pose[:, 2], pose[:, 3]
    campos = camera_position_from_spherical_angles(dist, elev, azim)
    R, T = campos_to_R_T(campos, theta)

    # mesh preprocessing + rasterization (rasterizer itself stays outside the kernel)
    verts_p = pre_process_mesh_pascal(verts)
    pix_to_face, bary = rasterize_simple(verts_p, faces, R, T, render_image_size)

    # post_process: center crop render_image_size -> render_size (identity when square)
    h0 = (render_image_size - render_size[0]) // 2
    w0 = (render_image_size - render_size[1]) // 2
    pix_to_face = pix_to_face[:, h0:h0 + render_size[0], w0:w0 + render_size[1]]
    bary = bary[:, h0:h0 + render_size[0], w0:w0 + render_size[1], :]

    Hc, Wc = render_size
    P = Hc * Wc
    pix_p = pix_to_face.reshape(B, 1, P).astype(jnp.int32)                        # (B, 1, P)
    bary_p = jnp.transpose(bary.reshape(B, P, 3), (0, 2, 1)).astype(jnp.float32)  # (B, 3, P)
    # NCHW is already channel-major: reshape to (B, C, P) is free — no HBM transpose pass.
    feat_p = forward_feature.reshape(B, C, P)

    fg, bg = fused_sim(pix_p, bary_p, feat_p, fmem_chunks, clutter_col)

    sim_fg = fg.reshape(B, Hc, Wc)                 # == torch.sum(proj * feat, dim=1)
    sim_bg = bg.reshape(B, 1, Hc, Wc)              # == conv2d(feat, clutter[:, :, None, None])
    return sim_fg, sim_bg


# --------------------------------------------------------------------------
if __name__ == "__main__":
    key = jax.random.PRNGKey(0)
    B, C = 2, 64
    render_size = (16, 16)
    n_points = 8     # vertex count of the synthetic mesh
    n_clutter = 16

    # TODO(synk): load_off reads a mesh file; replaced with a deterministic cube mesh.
    verts = jnp.array(
        [[x, y, z] for x in (-0.5, 0.5) for y in (-0.5, 0.5) for z in (-0.5, 0.5)],
        dtype=jnp.float32,
    )  # (8, 3)
    faces = jnp.array(
        [
            [0, 1, 3], [0, 3, 2],   # -x
            [4, 6, 7], [4, 7, 5],   # +x
            [0, 4, 5], [0, 5, 1],   # -y
            [2, 3, 7], [2, 7, 6],   # +y
            [0, 2, 6], [0, 6, 4],   # -z
            [1, 5, 7], [1, 7, 3],   # +z
        ],
        dtype=jnp.int32,
    )  # (12, 3)

    k_mem, k_feat = jax.random.split(key, 2)
    # feature_bank.memory: first n_points rows = vertex features, rest = clutter
    memory = jax.random.normal(k_mem, (n_points + n_clutter, C), dtype=jnp.float32)
    # Feed the big per-pixel feature stream in bf16 (halves HBM bytes of the
    # dominant stream); the kernel promotes per-op and accumulates in f32.
    # Deliberate approximation vs. the f32 torch module.
    forward_feature = jax.random.normal(
        k_feat, (B, C) + render_size, dtype=jnp.float32).astype(jnp.bfloat16)
    # pose = (distance, elevation[deg], azimuth[deg], theta[rad])
    pose = jnp.array([[5.0, 20.0, 30.0, 0.3],
                      [5.5, -10.0, 120.0, -0.5]], dtype=jnp.float32)

    fwd = jax.jit(
        lambda f, p: mesh_training_forward(f, p, memory, verts, faces, n_points, render_size)
    )
    sim_fg, sim_bg = fwd(forward_feature, pose)
    jax.block_until_ready((sim_fg, sim_bg))

    assert sim_fg.shape == (B, render_size[0], render_size[1])
    assert sim_bg.shape == (B, 1, render_size[0], render_size[1])
    assert bool(jnp.all(jnp.isfinite(sim_fg))) and bool(jnp.all(jnp.isfinite(sim_bg)))
    print("KERNEL_OK")
</pallas_src>

<mosaic_0001>
module attributes {stable_mosaic.version = 11 : i64} {
  func.func @_sim_kernel(%arg0: i32, %arg1: i32, %arg2: memref<1x1x256xi32, #tpu.memory_space<vmem>>, %arg3: memref<1x3x256xf32, #tpu.memory_space<vmem>>, %arg4: memref<1x64x256xbf16, #tpu.memory_space<vmem>>, %arg5: memref<1x64x48xf32, #tpu.memory_space<vmem>>, %arg6: memref<64x1xf32, #tpu.memory_space<vmem>>, %arg7: memref<1x2x256xf32, #tpu.memory_space<vmem>>) attributes {dimension_semantics = [#tpu.dimension_semantics<parallel>, #tpu.dimension_semantics<parallel>], iteration_bounds = array<i64: 2, 1>, scalar_prefetch = 0 : i64, scratch_operands = 0 : i64, tpu.core_type = #tpu.core_type<tc>, window_params = [{transform_indices = @transform_0, window_bounds = array<i64: 1, 1, 256>}, {transform_indices = @transform_1, window_bounds = array<i64: 1, 3, 256>}, {transform_indices = @transform_2, window_bounds = array<i64: 1, 64, 256>}, {pipeline_mode = #tpu.pipeline_mode<synchronous>, transform_indices = @transform_3, window_bounds = array<i64: 1, 64, 48>}, {pipeline_mode = #tpu.pipeline_mode<synchronous>, transform_indices = @transform_4, window_bounds = array<i64: 64, 1>}, {transform_indices = @transform_5, window_bounds = array<i64: 1, 2, 256>}]} {
    %c0 = arith.constant 0 : index
    %c0_0 = arith.constant 0 : index
    %c0_1 = arith.constant 0 : index
    %0 = vector.load %arg2[%c0, %c0_0, %c0_1] : memref<1x1x256xi32, #tpu.memory_space<vmem>>, vector<1x1x256xi32>
    %1 = vector.shape_cast %0 : vector<1x1x256xi32> to vector<1x256xi32>
    %c0_2 = arith.constant 0 : index
    %c0_3 = arith.constant 0 : index
    %c0_4 = arith.constant 0 : index
    %2 = vector.load %arg3[%c0_2, %c0_3, %c0_4] : memref<1x3x256xf32, #tpu.memory_space<vmem>>, vector<1x3x256xf32>
    %3 = vector.shape_cast %2 : vector<1x3x256xf32> to vector<3x256xf32>
    %c0_5 = arith.constant 0 : index
    %c0_6 = arith.constant 0 : index
    %c0_7 = arith.constant 0 : index
    %4 = vector.load %arg4[%c0_5, %c0_6, %c0_7] : memref<1x64x256xbf16, #tpu.memory_space<vmem>>, vector<1x64x256xbf16>
    %5 = vector.shape_cast %4 : vector<1x64x256xbf16> to vector<64x256xbf16>
    %6 = tpu.iota {dimensions = array<i32: 0>} : vector<16x256xi32>
    %c0_i32 = arith.constant 0 : i32
    %7 = vector.broadcast %c0_i32 : i32 to vector<16x256xi32>
    %8 = arith.addi %6, %7 : vector<16x256xi32>
    %9 = vector.broadcast %1 : vector<1x256xi32> to vector<16x256xi32>
    %10 = arith.cmpi eq, %8, %9 : vector<16x256xi32>
    %11 = vector.extract_strided_slice %3 {offsets = [0, 0], sizes = [1, 256], strides = [1, 1]} : vector<3x256xf32> to vector<1x256xf32>
    %cst = arith.constant 0.000000e+00 : f32
    %12 = vector.shape_cast %11 : vector<1x256xf32> to vector<1x256xf32>
    %13 = vector.broadcast %12 : vector<1x256xf32> to vector<16x256xf32>
    %14 = vector.broadcast %cst : f32 to vector<16x256xf32>
    %15 = arith.select %10, %13, %14 : vector<16x256xi1>, vector<16x256xf32>
    %16 = vector.extract_strided_slice %3 {offsets = [1, 0], sizes = [1, 256], strides = [1, 1]} : vector<3x256xf32> to vector<1x256xf32>
    %cst_8 = arith.constant 0.000000e+00 : f32
    %17 = vector.shape_cast %16 : vector<1x256xf32> to vector<1x256xf32>
    %18 = vector.broadcast %17 : vector<1x256xf32> to vector<16x256xf32>
    %19 = vector.broadcast %cst_8 : f32 to vector<16x256xf32>
    %20 = arith.select %10, %18, %19 : vector<16x256xi1>, vector<16x256xf32>
    %21 = vector.extract_strided_slice %3 {offsets = [2, 0], sizes = [1, 256], strides = [1, 1]} : vector<3x256xf32> to vector<1x256xf32>
    %cst_9 = arith.constant 0.000000e+00 : f32
    %22 = vector.shape_cast %21 : vector<1x256xf32> to vector<1x256xf32>
    %23 = vector.broadcast %22 : vector<1x256xf32> to vector<16x256xf32>
    %24 = vector.broadcast %cst_9 : f32 to vector<16x256xf32>
    %25 = arith.select %10, %23, %24 : vector<16x256xi1>, vector<16x256xf32>
    %26 = tpu.concatenate %15, %20, %25 in 0 : vector<16x256xf32>, vector<16x256xf32>, vector<16x256xf32> -> vector<48x256xf32>
    %c0_10 = arith.constant 0 : index
    %c0_11 = arith.constant 0 : index
    %c0_12 = arith.constant 0 : index
    %27 = vector.load %arg5[%c0_10, %c0_11, %c0_12] : memref<1x64x48xf32, #tpu.memory_space<vmem>>, vector<1x64x48xf32>
    %28 = vector.shape_cast %27 : vector<1x64x48xf32> to vector<64x48xf32>
    %cst_13 = arith.constant dense<0.000000e+00> : vector<64x256xf32>
    %29 = tpu.matmul %28, %26, %cst_13 {dimension_numbers = #tpu.dot_dimension_numbers<[1], [0], [0], [1], [0, 0, 1, 1], [], []>} : vector<64x48xf32>, vector<48x256xf32>, vector<64x256xf32> -> vector<64x256xf32>
    %30 = arith.extf %5 : vector<64x256xbf16> to vector<64x256xf32>
    %31 = arith.mulf %29, %30 : vector<64x256xf32>
    %cst_14 = arith.constant dense<0.000000e+00> : vector<256xf32>
    %32 = vector.multi_reduction <add>, %31, %cst_14 [0] : vector<64x256xf32> to vector<256xf32>
    %33 = vector.shape_cast %32 : vector<256xf32> to vector<1x256xf32>
    %c0_15 = arith.constant 0 : index
    %c0_16 = arith.constant 0 : index
    %c0_17 = arith.constant 0 : index
    %34 = vector.load %arg7[%c0_15, %c0_16, %c0_17] : memref<1x2x256xf32, #tpu.memory_space<vmem>>, vector<1x1x256xf32>
    %35 = vector.shape_cast %34 : vector<1x1x256xf32> to vector<1x256xf32>
    %36 = vector.shape_cast %33 : vector<1x256xf32> to vector<1x1x256xf32>
    tpu.vector_store %arg7[%c0_15, %c0_16, %c0_17], %36 {strides = array<i32>} : memref<1x2x256xf32, #tpu.memory_space<vmem>>, vector<1x1x256xf32>,
    %c0_18 = arith.constant 0 : index
    %c0_19 = arith.constant 0 : index
    %37 = vector.load %arg6[%c0_18, %c0_19] : memref<64x1xf32, #tpu.memory_space<vmem>>, vector<64x1xf32>
    %38 = arith.extf %5 : vector<64x256xbf16> to vector<64x256xf32>
    %39 = vector.broadcast %37 : vector<64x1xf32> to vector<64x256xf32>
    %40 = arith.mulf %39, %38 : vector<64x256xf32>
    %cst_20 = arith.constant dense<0.000000e+00> : vector<256xf32>
    %41 = vector.multi_reduction <add>, %40, %cst_20 [0] : vector<64x256xf32> to vector<256xf32>
    %42 = vector.shape_cast %41 : vector<256xf32> to vector<1x256xf32>
    %c0_21 = arith.constant 0 : index
    %c1 = arith.constant 1 : index
    %c0_22 = arith.constant 0 : index
    %43 = vector.load %arg7[%c0_21, %c1, %c0_22] : memref<1x2x256xf32, #tpu.memory_space<vmem>>, vector<1x1x256xf32>
    %44 = vector.shape_cast %43 : vector<1x1x256xf32> to vector<1x256xf32>
    %45 = vector.shape_cast %42 : vector<1x256xf32> to vector<1x1x256xf32>
    tpu.vector_store %arg7[%c0_21, %c1, %c0_22], %45 {strides = array<i32>} : memref<1x2x256xf32, #tpu.memory_space<vmem>>, vector<1x1x256xf32>,
    return
  }
  func.func @transform_0(%arg0: i32, %arg1: i32) -> (i32, i32, i32) {
    %c0_i32 = arith.constant 0 : i32
    %c0_i32_0 = arith.constant 0 : i32
    return %arg0, %c0_i32, %arg1 : i32, i32, i32
  }
  func.func @transform_1(%arg0: i32, %arg1: i32) -> (i32, i32, i32) {
    %c0_i32 = arith.constant 0 : i32
    %c0_i32_0 = arith.constant 0 : i32
    return %arg0, %c0_i32, %arg1 : i32, i32, i32
  }
  func.func @transform_2(%arg0: i32, %arg1: i32) -> (i32, i32, i32) {
    %c0_i32 = arith.constant 0 : i32
    %c0_i32_0 = arith.constant 0 : i32
    return %arg0, %c0_i32, %arg1 : i32, i32, i32
  }
  func.func @transform_3(%arg0: i32, %arg1: i32) -> (i32, i32, i32) {
    %c0_i32 = arith.constant 0 : i32
    %c0_i32_0 = arith.constant 0 : i32
    %c0_i32_1 = arith.constant 0 : i32
    %c0_i32_2 = arith.constant 0 : i32
    return %c0_i32, %c0_i32_0, %c0_i32_1 : i32, i32, i32
  }
  func.func @transform_4(%arg0: i32, %arg1: i32) -> (i32, i32) {
    %c0_i32 = arith.constant 0 : i32
    %c0_i32_0 = arith.constant 0 : i32
    %c0_i32_1 = arith.constant 0 : i32
    return %c0_i32, %c0_i32_0 : i32, i32
  }
  func.func @transform_5(%arg0: i32, %arg1: i32) -> (i32, i32, i32) {
    %c0_i32 = arith.constant 0 : i32
    %c0_i32_0 = arith.constant 0 : i32
    return %arg0, %c0_i32, %arg1 : i32, i32, i32
  }
}

</mosaic_0001>

<bundles_post_ra>
// kernel: neg.6
= control target key start
LH: loop header
LB: loop body
LE: loop exit
PB: predicated region body
PF: predicated region fallthrough
CT: control target
= control target key end

     0   :  { %s24_s0 = inlined_call_operand.vmem [shape: f32[2,3], index: 0, kind: input, shape index: {}]   ;;  %s25_s1 = inlined_call_operand.vmem [shape: f32[2,3], index: 1, kind: output, shape index: {}]  }
   0x1   :  { %v2_v0 = vld [vmem:[%s24_s0] sm:$0x3] }
   0x2   :  { %v5_v1 = vxor.u32 2147483648, %v2_v0 }
   0x4   :  { %7 = vst [vmem:[%s25_s1] sm:$0x3] %v5_v1 }

// kernel: squeeze.98
= control target key start
LH: loop header
LB: loop body
LE: loop exit
PB: predicated region body
PF: predicated region fallthrough
CT: control target
= control target key end

     0   :  { %s149_s0 = inlined_call_operand.vmem [shape: f32[2,256], index: 0, kind: input, shape index: {}]   ;;  %s150_s1 = inlined_call_operand.hbm [shape: f32[2,16,16], index: 1, kind: output, shape index: {}]  }
   0x1   :  { %v71_v0 = vld [vmem:[%s149_s0 + $0x2] sm:$0x3]  ;;  %v9_v1 = vld [vmem:[%s149_s0] sm:$0x3] }
   0x2   :  { %8 = vst [vmem:[#allocation2 + $0x8] sm:$0x3] %v71_v0  ;;  %10 = vst [vmem:[#allocation2] sm:$0x3] %v9_v1 }
   0x3   :  { %2 = vsyncpa [#allocation1], 0  ;;  %vm12_vm0 = vcmask 130048   ;;  %s104_s0 = smov 112   ;;  %s105_s10 = smov 80  }
   0x4   :  { %s106_s11 = smov 96   ;;  %s107_s12 = smov 64  }
   0x5   :  { %s108_s13 = smov 48   ;;  %s109_s14 = smov 32  }
   0x6   :  { %s110_s15 = smov 16   ;;  %s111_s16 = smov [#allocation0]  }
   0x7   :  { %s65_s17 = sshll.u32 %s111_s16, 4  ;;  %s66_s17 = int_to_ptr.vmem [resolvable:$true] %s65_s17 }
   0x8   :  { %s80_s18 = scalar_lea.vmem %s66_s17, 512  ;;  %p85_p1 = scmp.lt.s32.totalorder %s66_s17, %s66_s17 }
   0x9   :  { %v19_v2 = vld.sshfl [vmem:[#allocation2] sm:$0xff pattern:$0x99999180]   ;;  %p81_p0 = scmp.ne.s32.totalorder %s66_s17, %s80_s18  ;;  %p86_p2 = scmp.lt.s32.totalorder %s80_s18, %s80_s18 }
   0xa   :  { %v11_v3 = vld [vmem:[#allocation2] sm:$0x3]   ;;  %20 = vrot.lane.b32.xlu0 %v19_v2, %s104_s0  ;;  %32 = vrot.lane.b32.xlu1 %v19_v2, %s105_s10  ;;  %v15_v4 = vld [vmem:[#allocation2 + $0x8] sm:$0x3]  }
   0xb   :  { %13 = vst.msk [vmem:[#allocation0] ss:$16 sm:$0x3] %vm12_vm0, %v11_v3   ;;  %18 = vst.msk [vmem:[#allocation0 + $0x8] ss:$16 sm:$0x3] %vm12_vm0, %v15_v4   ;;  %p87_p3 = por %p86_p2, %p85_p1 }
   0xd   :  { %p88_p4 = pnand %p87_p3, %p81_p0 }
   0xe   :  { %26 = vrot.lane.b32.xlu0 %v19_v2, %s106_s11  ;;  %38 = vrot.lane.b32.xlu1 %v19_v2, %s107_s12 }
  0x12   :  { %44 = vrot.lane.b32.xlu0 %v19_v2, %s108_s13  ;;  %50 = vrot.lane.b32.xlu1 %v19_v2, %s109_s14 }
  0x16   :  { %56 = vrot.lane.b32.xlu0 %v19_v2, %s110_s15 }
  0x7c   :  { %v21_v5 = vpop.permute.xlu0 %20   ;;  %v33_v6 = vpop.permute.xlu1 %32  }
  0x7d   :  { %24 = vst.msk [vmem:[#allocation0 + $0x1] ss:$8 sm:$0xf] %vm12_vm0, %v21_v5   ;;  %36 = vst.msk [vmem:[#allocation0 + $0x3] ss:$8 sm:$0xf] %vm12_vm0, %v33_v6  }
  0x80   :  { %v27_v7 = vpop.permute.xlu0 %26   ;;  %v39_v8 = vpop.permute.xlu1 %38  }
  0x81   :  { %30 = vst.msk [vmem:[#allocation0 + $0x2] ss:$8 sm:$0xf] %vm12_vm0, %v27_v7   ;;  %42 = vst.msk [vmem:[#allocation0 + $0x4] ss:$8 sm:$0xf] %vm12_vm0, %v39_v8  }
  0x84   :  { %v45_v9 = vpop.permute.xlu0 %44   ;;  %v51_v10 = vpop.permute.xlu1 %50  }
  0x85   :  { %48 = vst.msk [vmem:[#allocation0 + $0x5] ss:$8 sm:$0xf] %vm12_vm0, %v45_v9   ;;  %54 = vst.msk [vmem:[#allocation0 + $0x6] ss:$8 sm:$0xf] %vm12_vm0, %v51_v10  }
  0x88   :  { %v57_v11 = vpop.permute.xlu0 %56  }
  0x89   :  { %60 = vst.msk [vmem:[#allocation0 + $0x7] ss:$8 sm:$0xf] %vm12_vm0, %v57_v11  }
  0x8a   :  { %91 = shalt.err (!%p88_p4)
}
  0x8b   :  { %s92_s21 = scalar_lea.hbm %s150_s1, 512 }
  0x8c   :  { %p93_p5 = scmp.ne.s32.totalorder %s150_s1, %s92_s21  ;;  %p96_p6 = scmp.lt.u32.totalorder %s92_s21, %s150_s1 }
  0x8e   :  { %p98_p7 = pnand %p96_p6, %p93_p5 }
  0x90   :  { %101 = shalt.err (!%p98_p7)
}
  0x91   :  { %68 = dma.vmem_to_hbm [thread:$0]  %s66_s17, 512, %s150_s1, [#allocation1]  }
  0x92   :  { %102 = dma.done.wait [#allocation1], 512  }
  0x93   :  { %103 = vsyncadd [#allocation1], 4294966784 }
  0x94   :  { %70 = vsyncpa [#allocation1], 1 }

// kernel: squeeze.99
= control target key start
LH: loop header
LB: loop body
LE: loop exit
PB: predicated region body
PF: predicated region fallthrough
CT: control target
= control target key end

     0   :  { %s149_s0 = inlined_call_operand.vmem [shape: f32[2,256], index: 0, kind: input, shape index: {}]   ;;  %s150_s1 = inlined_call_operand.hbm [shape: f32[2,1,16,16], index: 1, kind: output, shape index: {}]  }
   0x1   :  { %v71_v0 = vld [vmem:[%s149_s0 + $0x2] sm:$0x3]  ;;  %v9_v1 = vld [vmem:[%s149_s0] sm:$0x3] }
   0x2   :  { %8 = vst [vmem:[#allocation2 + $0x8] sm:$0x3] %v71_v0  ;;  %10 = vst [vmem:[#allocation2] sm:$0x3] %v9_v1 }
   0x3   :  { %2 = vsyncpa [#allocation1], 0  ;;  %vm12_vm0 = vcmask 130048   ;;  %s104_s0 = smov 112   ;;  %s105_s10 = smov 80  }
   0x4   :  { %s106_s11 = smov 96   ;;  %s107_s12 = smov 64  }
   0x5   :  { %s108_s13 = smov 48   ;;  %s109_s14 = smov 32  }
   0x6   :  { %s110_s15 = smov 16   ;;  %s111_s16 = smov [#allocation0]  }
   0x7   :  { %s65_s17 = sshll.u32 %s111_s16, 4  ;;  %s66_s17 = int_to_ptr.vmem [resolvable:$true] %s65_s17 }
   0x8   :  { %s80_s18 = scalar_lea.vmem %s66_s17, 512  ;;  %p85_p1 = scmp.lt.s32.totalorder %s66_s17, %s66_s17 }
   0x9   :  { %v19_v2 = vld.sshfl [vmem:[#allocation2] sm:$0xff pattern:$0x99999180]   ;;  %p81_p0 = scmp.ne.s32.totalorder %s66_s17, %s80_s18  ;;  %p86_p2 = scmp.lt.s32.totalorder %s80_s18, %s80_s18 }
   0xa   :  { %v11_v3 = vld [vmem:[#allocation2] sm:$0x3]   ;;  %20 = vrot.lane.b32.xlu0 %v19_v2, %s104_s0  ;;  %32 = vrot.lane.b32.xlu1 %v19_v2, %s105_s10  ;;  %v15_v4 = vld [vmem:[#allocation2 + $0x8] sm:$0x3]  }
   0xb   :  { %13 = vst.msk [vmem:[#allocation0] ss:$16 sm:$0x3] %vm12_vm0, %v11_v3   ;;  %18 = vst.msk [vmem:[#allocation0 + $0x8] ss:$16 sm:$0x3] %vm12_vm0, %v15_v4   ;;  %p87_p3 = por %p86_p2, %p85_p1 }
   0xd   :  { %p88_p4 = pnand %p87_p3, %p81_p0 }
   0xe   :  { %26 = vrot.lane.b32.xlu0 %v19_v2, %s106_s11  ;;  %38 = vrot.lane.b32.xlu1 %v19_v2, %s107_s12 }
  0x12   :  { %44 = vrot.lane.b32.xlu0 %v19_v2, %s108_s13  ;;  %50 = vrot.lane.b32.xlu1 %v19_v2, %s109_s14 }
  0x16   :  { %56 = vrot.lane.b32.xlu0 %v19_v2, %s110_s15 }
  0x7c   :  { %v21_v5 = vpop.permute.xlu0 %20   ;;  %v33_v6 = vpop.permute.xlu1 %32  }
  0x7d   :  { %24 = vst.msk [vmem:[#allocation0 + $0x1] ss:$8 sm:$0xf] %vm12_vm0, %v21_v5   ;;  %36 = vst.msk [vmem:[#allocation0 + $0x3] ss:$8 sm:$0xf] %vm12_vm0, %v33_v6  }
  0x80   :  { %v27_v7 = vpop.permute.xlu0 %26   ;;  %v39_v8 = vpop.permute.xlu1 %38  }
  0x81   :  { %30 = vst.msk [vmem:[#allocation0 + $0x2] ss:$8 sm:$0xf] %vm12_vm0, %v27_v7   ;;  %42 = vst.msk [vmem:[#allocation0 + $0x4] ss:$8 sm:$0xf] %vm12_vm0, %v39_v8  }
  0x84   :  { %v45_v9 = vpop.permute.xlu0 %44   ;;  %v51_v10 = vpop.permute.xlu1 %50  }
  0x85   :  { %48 = vst.msk [vmem:[#allocation0 + $0x5] ss:$8 sm:$0xf] %vm12_vm0, %v45_v9   ;;  %54 = vst.msk [vmem:[#allocation0 + $0x6] ss:$8 sm:$0xf] %vm12_vm0, %v51_v10  }
  0x88   :  { %v57_v11 = vpop.permute.xlu0 %56  }
  0x89   :  { %60 = vst.msk [vmem:[#allocation0 + $0x7] ss:$8 sm:$0xf] %vm12_vm0, %v57_v11  }
  0x8a   :  { %91 = shalt.err (!%p88_p4)
}
  0x8b   :  { %s92_s21 = scalar_lea.hbm %s150_s1, 512 }
  0x8c   :  { %p93_p5 = scmp.ne.s32.totalorder %s150_s1, %s92_s21  ;;  %p96_p6 = scmp.lt.u32.totalorder %s92_s21, %s150_s1 }
  0x8e   :  { %p98_p7 = pnand %p96_p6, %p93_p5 }
  0x90   :  { %101 = shalt.err (!%p98_p7)
}
  0x91   :  { %68 = dma.vmem_to_hbm [thread:$0]  %s66_s17, 512, %s150_s1, [#allocation1]  }
  0x92   :  { %102 = dma.done.wait [#allocation1], 512  }
  0x93   :  { %103 = vsyncadd [#allocation1], 4294966784 }
  0x94   :  { %70 = vsyncpa [#allocation1], 1 }

// kernel: _lambda_.1
= control target key start
LH: loop header
LB: loop body
LE: loop exit
PB: predicated region body
PF: predicated region fallthrough
CT: control target
= control target key end

     0   :  { %s1030_s18 = smov 0   ;;  %s1032_s19 = smov 0   ;;  %s1309_s0 = inlined_call_operand.vmem [shape: s32[2,1,256], index: 0, kind: input, shape index: {}]   ;;  %s1310_s1 = inlined_call_operand.vmem [shape: f32[2,3,256], index: 1, kind: input, shape index: {}]   ;;  %s1311_s2 = inlined_call_operand.vmem [shape: bf16[2,64,256], index: 2, kind: input, shape index: {}]   ;;  %s1312_s3 = inlined_call_operand.vmem [shape: f32[1,64,48], index: 3, kind: input, shape index: {}]   ;;  %s1313_s4 = inlined_call_operand.vmem [shape: f32[64,1], index: 4, kind: input, shape index: {}]   ;;  %s1314_s5 = inlined_call_operand.vmem [shape: f32[2,2,256], index: 5, kind: output, shape index: {}]  }
   0x1   :  { %s1034_s20 = smov 0  }
   0x2 LB: > { %s27_s21 = sadd.s32 1, %s991_s19  ;;  %p886_p0 = scmp.ge.s32.totalorder %s995_s20, 1  ;;  %s995_s20 = sphi %s1034_s20, %s15_s20   ;;  %s991_s19 = sphi %s1032_s19, %s1322_s19   ;;  %s987_s18 = sphi %s1030_s18, %s1321_s18  }
   0x3   : > { %p29_p1 = scmp.ge.s32.totalorder %s27_s21, 2  ;;  %p241_p2 = scmp.lt.s32.totalorder %s995_s20, 3 }
   0x5   : > { %s1324_s21 = smov (%p29_p1, %s27_s21), 0  ;;  %p242_p3 = pnand %p886_p0, %p241_p2 }
   0x6   : > { %p295_p4 = scmp.lt.s32.totalorder (!%p242_p3), %s987_s18, 1  ;;  %v343_v0 = vlaneseq (!%p242_p3)  ;;  %v997_v1 = vmov (!%p242_p3), 0.0   ;;  %v998_v3 = vmov (!%p242_p3), 0   ;;  %v652_v4 = vld [vmem:[%s1313_s4] sm:$0xff] (!%p242_p3)  ;;  %v654_v5 = vld [vmem:[%s1313_s4 + $0x10] sm:$0xff] (!%p242_p3)  ;;  %v653_v9 = vld [vmem:[%s1313_s4 + $0x8] sm:$0xff] (!%p242_p3) }
   0x7   : > { %245 = sbr.rel (%p242_p3) target bundleno = 293 (0x125), region = 40  ;;  %522 = vmatprep.mubr.f32.mxu0 (!%p242_p3), %v997_v1  ;;  %546 = vmatprep.mubr.f32.mxu1 (!%p242_p3), %v997_v1  ;;  %v655_v14 = vld [vmem:[%s1313_s4 + $0x18] sm:$0xff] (!%p242_p3)  ;;  %v656_v25 = vld [vmem:[%s1313_s4 + $0x20] sm:$0xff] (!%p242_p3)  ;;  %v657_v27 = vld [vmem:[%s1313_s4 + $0x28] sm:$0xff] (!%p242_p3)  ;;  %vm433_vm6 = vcmask (!%p242_p3), 392192  }
   0x8   : > { %v1053_v2 = vshrl.u32 (!%p242_p3), %v343_v0, 7  ;;  %971 = vset.pattern.permute.xlu0 (!%p242_p3), %v998_v3  ;;  %972 = vset.pattern.permute.xlu1 (!%p242_p3), %v998_v3  ;;  %v658_v37 = vld [vmem:[%s1313_s4 + $0x30] sm:$0xff] (!%p242_p3)  ;;  %v659_v38 = vld [vmem:[%s1313_s4 + $0x38] sm:$0xff] (!%p242_p3)  ;;  %v425_v43 = vld [vmem:[%s1312_s3] sm:$0xff] (!%p242_p3)  ;;  %vm1255_vm7 = vcmp.lt.s32.totalorder (!%p242_p3), %v343_v0, 256 }
   0x9   : > { %662 = vperm.xlu0 (!%p242_p3), %971, %v652_v4   ;;  %672 = vperm.xlu1 (!%p242_p3), %972, %v654_v5   ;;  %v429_v44 = vld [vmem:[%s1312_s3 + $0x20] sm:$0xff] (!%p242_p3)  ;;  %v426_v45 = vld [vmem:[%s1312_s3 + $0x8] sm:$0xff] (!%p242_p3)  ;;  %v427_v47 = vld [vmem:[%s1312_s3 + $0x10] sm:$0xff] (!%p242_p3) }
   0xa   : > { %v348_v6 = vsub.s32 (!%p242_p3), 0, %v1053_v2  ;;  %v352_v7 = vsub.s32 (!%p242_p3), 1, %v1053_v2  ;;  %v365_v8 = vsub.s32 (!%p242_p3), 4, %v1053_v2  ;;  %v345_v10 = vadd.s32 (!%p242_p3), 8, %v1053_v2  ;;  %v430_v46 = vld [vmem:[%s1312_s3 + $0x28] sm:$0xff] (!%p242_p3)  ;;  %v431_v48 = vld [vmem:[%s1312_s3 + $0x30] sm:$0xff] (!%p242_p3) }
   0xb   : > { %v387_v11 = vsub.s32 (!%p242_p3), 5, %v1053_v2  ;;  %v405_v12 = vsub.s32 (!%p242_p3), 2, %v1053_v2  ;;  %v409_v13 = vsub.s32 (!%p242_p3), 6, %v1053_v2  ;;  %v428_v49 = vld [vmem:[%s1312_s3 + $0x18] sm:$0xff] (!%p242_p3) }
   0xc   : > { %v432_v50 = vld [vmem:[%s1312_s3 + $0x38] sm:$0xff] (!%p242_p3) }
   0xd   : > { %667 = vperm.xlu0 (!%p242_p3), %971, %v653_v9   ;;  %677 = vperm.xlu1 (!%p242_p3), %972, %v655_v14  }
   0xe   : > { %s1326_s18 = smov (!%p295_p4, %s987_s18), 1 }
   0xf   : > { %s887_s26 = sshll.u32 %s1326_s18, 1  ;;  %s917_s27 = sshll.u32 %s1326_s18, 3 }
  0x10   : > { %s301_s7 = scalar_lea.vmem %s1309_s0, %s887_s26  ;;  %s311_s10 = scalar_lea.vmem %s1310_s1, %s917_s27 }
  0x11   : > { %v333_v15 = vld [vmem:[%s301_s7] sm:$0x3]  ;;  %682 = vperm.xlu0 %971, %v656_v25   ;;  %687 = vperm.xlu1 %972, %v657_v27   ;;  %s918_s16 = sshll.u32 %s1326_s18, 6  ;;  %s919_s24 = sshll.u32 %s1326_s18, 2 }
  0x12   : > { %v334_v16 = vld [vmem:[%s311_s10] sm:$0x77]  ;;  %v353_v17 = vrot.slane %v333_v15, %v352_v7  ;;  %v349_v19 = vrot.slane %v333_v15, %v348_v6  ;;  %s1170_s23 = scalar_lea.vmem %s1311_s2, %s918_s16  ;;  %s1252_s27 = scalar_lea.vmem %s1314_s5, %s919_s24 }
  0x13   : > { %v366_v18 = vrot.slane %v334_v16, %v365_v8  ;;  %v362_v20 = vrot.slane %v334_v16, %v348_v6  ;;  %v388_v21 = vrot.slane %v334_v16, %v387_v11  ;;  %v384_v22 = vrot.slane %v334_v16, %v352_v7  ;;  %v1173_v51 = vld [vmem:[%s1170_s23] sm:$0xff]  ;;  %v1176_v52 = vld [vmem:[%s1170_s23 + $0x10] sm:$0xff]  ;;  %v1179_v53 = vld [vmem:[%s1170_s23 + $0x8] sm:$0xff] }
  0x14   : > { %v410_v23 = vrot.slane %v334_v16, %v409_v13  ;;  %v406_v24 = vrot.slane %v334_v16, %v405_v12  ;;  %vm355_vm0 = vcmp.eq.s32.totalorder %v1053_v2, %v353_v17  ;;  %vm357_vm1 = vcmp.eq.s32.totalorder %v345_v10, %v353_v17  ;;  %v1184_v57 = vld [vmem:[%s1170_s23 + $0x18] sm:$0xff]  ;;  %v1191_v63 = vld [vmem:[%s1170_s23 + $0x20] sm:$0xff] }
  0x15   : > { %v376_v26 = vrot.slane %v366_v18, %v348_v6  ;;  %vm354_vm2 = vcmp.eq.s32.totalorder %v1053_v2, %v349_v19  ;;  %vm1090_vm3 = vmpackc.low %vm357_vm1, %vm355_vm0  ;;  %vm356_vm4 = vcmp.eq.s32.totalorder %v345_v10, %v349_v19  ;;  %v372_v29 = vrot.slane %v362_v20, %v348_v6  ;;  %692 = vperm.xlu0 %971, %v658_v37   ;;  %v1200_v6 = vld [vmem:[%s1170_s23 + $0x28] sm:$0xff] }
  0x16   : > { %v398_v30 = vrot.slane %v388_v21, %v352_v7  ;;  %v394_v31 = vrot.slane %v384_v22, %v352_v7  ;;  %vm1094_vm5 = vmpackc.low %vm356_vm4, %vm354_vm2  ;;  %v420_v34 = vrot.slane %v410_v23, %v405_v12  ;;  %v416_v40 = vrot.slane %v406_v24, %v405_v12  ;;  %697 = vperm.xlu1 %972, %v659_v38   ;;  %v1219_v21 = vld [vmem:[%s1170_s23 + $0x30] sm:$0xff]  ;;  %v1222_v22 = vld [vmem:[%s1170_s23 + $0x38] sm:$0xff] }
  0x17   : > { %v920_v32 = vpack.c.bf16 %v376_v26, %v376_v26  ;;  %v923_v35 = vpack.c.bf16 %v372_v29, %v372_v29  ;;  %v571_v54 = vunpack.c.l.bf16 %v1173_v51  ;;  %v572_v55 = vunpack.c.h.bf16 %v1173_v51 }
  0x18   : > { %v926_v36 = vpack.c.bf16 %v398_v30, %v398_v30  ;;  %v929_v39 = vpack.c.bf16 %v394_v31, %v394_v31  ;;  %v932_v41 = vpack.c.bf16 %v420_v34, %v420_v34  ;;  %v935_v42 = vpack.c.bf16 %v416_v40, %v416_v40 }
  0x19   : > { %922 = vmatprep.subr.msk.bf16.mxu0 %vm1090_vm3, %v920_v32  ;;  %938 = vmatprep.subr.msk.bf16.mxu1 %vm1090_vm3, %v920_v32  ;;  %v575_v59 = vunpack.c.l.bf16 %v1176_v52  ;;  %v576_v60 = vunpack.c.h.bf16 %v1176_v52  ;;  %v573_v61 = vunpack.c.l.bf16 %v1179_v53  ;;  %v574_v62 = vunpack.c.h.bf16 %v1179_v53 }
  0x1a   : > { %925 = vmatpush1.bf16.msk.msra.mxu0 %vm1094_vm5, %v923_v35  ;;  %941 = vmatpush1.bf16.msk.msra.mxu1 %vm1094_vm5, %v923_v35  ;;  %v577_v4 = vunpack.c.l.bf16 %v1184_v57  ;;  %v578_v5 = vunpack.c.h.bf16 %v1184_v57  ;;  %v579_v8 = vunpack.c.l.bf16 %v1191_v63  ;;  %v580_v9 = vunpack.c.h.bf16 %v1191_v63 }
  0x1b   : > { %928 = vmatprep.subr.msk.bf16.mxu0 %vm1090_vm3, %v926_v36  ;;  %939 = vmatprep.subr.msk.bf16.mxu1 %vm1090_vm3, %v926_v36  ;;  %v581_v15 = vunpack.c.l.bf16 %v1200_v6  ;;  %v582_v16 = vunpack.c.h.bf16 %v1200_v6  ;;  %v583_v29 = vunpack.c.l.bf16 %v1219_v21  ;;  %v584_v30 = vunpack.c.h.bf16 %v1219_v21 }
  0x1c   : > { %v585_v31 = vunpack.c.l.bf16 %v1222_v22  ;;  %v586_v32 = vunpack.c.h.bf16 %v1222_v22 }
  0x1e   : > { %931 = vmatpush1.bf16.msk.msra.mxu0 %vm1094_vm5, %v929_v39  ;;  %942 = vmatpush1.bf16.msk.msra.mxu1 %vm1094_vm5, %v929_v39 }
  0x1f   : > { %934 = vmatprep.subr.msk.bf16.mxu0 %vm1090_vm3, %v932_v41  ;;  %940 = vmatprep.subr.msk.bf16.mxu1 %vm1090_vm3, %v932_v41 }
  0x22   : > { %937 = vmatpush1.bf16.msk.msra.mxu0 %vm1094_vm5, %v935_v42  ;;  %943 = vmatpush1.bf16.msk.msra.mxu1 %vm1094_vm5, %v935_v42 }
  0x25   : > { %906 = vmatmul.mubr.msk.f32.vlgmr.msra.gmra.mrb[0].mxu0 %vm433_vm6, %v425_v43  ;;  %910 = vmatmul.mubr.msk.f32.vlgmr.msra.gmra.mrb[0].mxu1 %vm433_vm6, %v429_v44 }
  0x26   : > { %528 = vmatprep.mubr.f32.mxu0 %v997_v1  ;;  %552 = vmatprep.mubr.f32.mxu1 %v997_v1 }
  0x29   : > { %907 = vmatmul.mubr.msk.f32.gmra.mrb[2].mxu0 %vm433_vm6, %v426_v45  ;;  %911 = vmatmul.mubr.msk.f32.gmra.mrb[2].mxu1 %vm433_vm6, %v430_v46 }
  0x2a   : > { %534 = vmatprep.mubr.f32.mxu0 %v997_v1  ;;  %558 = vmatprep.mubr.f32.mxu1 %v997_v1 }
  0x2d   : > { %908 = vmatmul.mubr.msk.f32.gmra.mrb[4].mxu0 %vm433_vm6, %v427_v47  ;;  %912 = vmatmul.mubr.msk.f32.gmra.mrb[4].mxu1 %vm433_vm6, %v431_v48 }
  0x2e   : > { %540 = vmatprep.mubr.f32.mxu0 %v997_v1  ;;  %564 = vmatprep.mubr.f32.mxu1 %v997_v1 }
  0x31   : > { %909 = vmatmul.mubr.msk.f32.gmra.mrb[6].mxu0 %vm433_vm6, %v428_v49  ;;  %913 = vmatmul.mubr.msk.f32.gmra.mrb[6].mxu1 %vm433_vm6, %v432_v50 }
  0x88   : > { %v663_v56 = vpop.permute.xlu0 %662  ;;  %v673_v58 = vpop.permute.xlu1 %672 }
  0x89   : > { %v700_v1 = vmul.f32 %v663_v56, %v571_v54  ;;  %v701_v3 = vmul.f32 %v663_v56, %v572_v55  ;;  %v704_v10 = vmul.f32 %v673_v58, %v575_v59  ;;  %v705_v11 = vmul.f32 %v673_v58, %v576_v60 }
  0x8c   : > { %v668_v7 = vpop.permute.xlu0 %667  ;;  %v678_v14 = vpop.permute.xlu1 %677 }
  0x8d   : > { %v702_v12 = vmul.f32 %v668_v7, %v573_v61  ;;  %v703_v13 = vmul.f32 %v668_v7, %v574_v62  ;;  %v706_v19 = vmul.f32 %v678_v14, %v577_v4  ;;  %v707_v20 = vmul.f32 %v678_v14, %v578_v5 }
  0x8f   : > { %v716_v17 = vadd.f32 %v702_v12, %v700_v1  ;;  %v729_v18 = vadd.f32 %v703_v13, %v701_v3  ;;  %v999_v1 = vmov 1966171168  }
  0x90   : > { %v683_v23 = vpop.permute.xlu0 %682  ;;  %v688_v28 = vpop.permute.xlu1 %687  ;;  %v633_v3 = vunpack.c.l.s4 %v999_v1 }
  0x91   : > { %v717_v24 = vadd.f32 %v716_v17, %v704_v10  ;;  %v730_v25 = vadd.f32 %v729_v18, %v705_v11  ;;  %v708_v26 = vmul.f32 %v683_v23, %v579_v8  ;;  %v709_v27 = vmul.f32 %v683_v23, %v580_v9 }
  0x92   : > { %v710_v35 = vmul.f32 %v688_v28, %v581_v15  ;;  %v711_v36 = vmul.f32 %v688_v28, %v582_v16  ;;  %v634_v13 = vunpack.c.0.s8 %v633_v3 }
  0x93   : > { %v718_v33 = vadd.f32 %v717_v24, %v706_v19  ;;  %v731_v34 = vadd.f32 %v730_v25, %v707_v20 }
  0x94   : > { %v693_v39 = vpop.permute.xlu0 %692  ;;  %v1245_v20 = vsub.s32 %v634_v13, %v1053_v2 }
  0x95   : > { %v719_v37 = vadd.f32 %v718_v33, %v708_v26  ;;  %v732_v38 = vadd.f32 %v731_v34, %v709_v27  ;;  %v698_v40 = vpop.permute.xlu1 %697  ;;  %v712_v41 = vmul.f32 %v693_v39, %v583_v29  ;;  %v713_v42 = vmul.f32 %v693_v39, %v584_v30 }
  0x96   : > { %v714_v45 = vmul.f32 %v698_v40, %v585_v31  ;;  %v715_v46 = vmul.f32 %v698_v40, %v586_v32 }
  0x97   : > { %v720_v43 = vadd.f32 %v719_v37, %v710_v35  ;;  %v733_v44 = vadd.f32 %v732_v38, %v711_v36 }
  0x99   : > { %v721_v47 = vadd.f32 %v720_v43, %v712_v41  ;;  %v734_v48 = vadd.f32 %v733_v44, %v713_v42 }
  0x9b   : > { %v722_v49 = vadd.f32 %v721_v47, %v714_v45  ;;  %v735_v50 = vadd.f32 %v734_v48, %v715_v46 }
  0x9d   : > { %v723_v56 = vrot.slane %v722_v49, 4  ;;  %v736_v58 = vrot.slane %v735_v50, 4 }
  0x9f   : > { %v724_v7 = vadd.f32 %v723_v56, %v722_v49  ;;  %v737_v10 = vadd.f32 %v736_v58, %v735_v50 }
  0xa1   : > { %v725_v11 = vrot.slane %v724_v7, 2  ;;  %v738_v12 = vrot.slane %v737_v10, 2 }
  0xa3   : > { %v726_v14 = vadd.f32 %v725_v11, %v724_v7  ;;  %v739_v17 = vadd.f32 %v738_v12, %v737_v10 }
  0xa5   : > { %v727_v18 = vrot.slane %v726_v14, 1  ;;  %v740_v19 = vrot.slane %v739_v17, 1 }
  0xa7   : > { %v728_v23 = vadd.f32 %v727_v18, %v726_v14  ;;  %v741_v24 = vadd.f32 %v740_v19, %v739_v17 }
  0xa9   : > { %v744_v25 = vcombine.low %v728_v23, %v741_v24 }
  0xab   : > { %v751_v26 = vrot.slane %v744_v25, %v1245_v20 }
  0xad   : > { %v758_v2 = vrot.slane %v751_v26, %v1245_v20 }
  0xaf   : > { %914 = vst.msk [vmem:[%s1252_s27 + $0x1] ss:$2 sm:$0x3] %vm1255_vm7, %v758_v2 }
  0xf8   : > { %v524_v28 = vpop.f32.mrb[0].mxu0  ;;  %v548_v33 = vpop.f32.mrb[0].mxu1 }
  0xf9   : > { %v526_v34 = vpop.f32.mrb[1].mxu0  ;;  %v550_v35 = vpop.f32.mrb[1].mxu1  ;;  %v587_v38 = vmul.f32 %v571_v54, %v524_v28 }
  0xfa   : > { %v588_v41 = vmul.f32 %v572_v55, %v526_v34  ;;  %v596_v52 = vmul.f32 %v580_v9, %v550_v35 }
  0xfc   : > { %v530_v36 = vpop.f32.mrb[2].mxu0  ;;  %v554_v37 = vpop.f32.mrb[2].mxu1 }
  0xfd   : > { %v589_v0 = vmul.f32 %v573_v61, %v530_v36  ;;  %v532_v39 = vpop.f32.mrb[3].mxu0  ;;  %v556_v40 = vpop.f32.mrb[3].mxu1  ;;  %v597_v3 = vmul.f32 %v581_v15, %v554_v37 }
  0xfe   : > { %v590_v42 = vmul.f32 %v574_v62, %v532_v39 }
  0xff   : > { %v603_v43 = vadd.f32 %v589_v0, %v587_v38 }
 0x100   : > { %v616_v44 = vadd.f32 %v590_v42, %v588_v41  ;;  %v536_v45 = vpop.f32.mrb[4].mxu0  ;;  %v560_v46 = vpop.f32.mrb[4].mxu1 }
 0x101   : > { %v591_v47 = vmul.f32 %v575_v59, %v536_v45  ;;  %v538_v48 = vpop.f32.mrb[5].mxu0  ;;  %v562_v54 = vpop.f32.mrb[5].mxu1  ;;  %v595_v59 = vmul.f32 %v579_v8, %v548_v33  ;;  %v599_v57 = vmul.f32 %v583_v29, %v560_v46 }
 0x102   : > { %v592_v61 = vmul.f32 %v576_v60, %v538_v48  ;;  %v600_v63 = vmul.f32 %v584_v30, %v562_v54 }
 0x103   : > { %v604_v49 = vadd.f32 %v603_v43, %v591_v47 }
 0x104   : > { %v617_v50 = vadd.f32 %v616_v44, %v592_v61  ;;  %v542_v56 = vpop.f32.mrb[6].mxu0  ;;  %v566_v51 = vpop.f32.mrb[6].mxu1 }
 0x105   : > { %v593_v53 = vmul.f32 %v577_v4, %v542_v56  ;;  %v544_v55 = vpop.f32.mrb[7].mxu0  ;;  %v568_v62 = vpop.f32.mrb[7].mxu1  ;;  %v598_v4 = vmul.f32 %v582_v16, %v556_v40  ;;  %v601_v8 = vmul.f32 %v585_v31, %v566_v51 }
 0x106   : > { %v594_v58 = vmul.f32 %v578_v5, %v544_v55  ;;  %v602_v11 = vmul.f32 %v586_v32, %v568_v62 }
 0x107   : > { %v605_v1 = vadd.f32 %v604_v49, %v593_v53 }
 0x108   : > { %v618_v60 = vadd.f32 %v617_v50, %v594_v58 }
 0x109   : > { %v606_v7 = vadd.f32 %v605_v1, %v595_v59 }
 0x10a   : > { %v619_v10 = vadd.f32 %v618_v60, %v596_v52 }
 0x10b   : > { %v607_v5 = vadd.f32 %v606_v7, %v597_v3 }
 0x10c   : > { %v620_v9 = vadd.f32 %v619_v10, %v598_v4 }
 0x10d   : > { %v608_v15 = vadd.f32 %v607_v5, %v599_v57 }
 0x10e   : > { %v621_v12 = vadd.f32 %v620_v9, %v600_v63 }
 0x10f   : > { %v609_v13 = vadd.f32 %v608_v15, %v601_v8 }
 0x110   : > { %v622_v6 = vadd.f32 %v621_v12, %v602_v11 }
 0x111   : > { %v610_v16 = vrot.slane %v609_v13, 4 }
 0x112   : > { %v623_v14 = vrot.slane %v622_v6, 4 }
 0x113   : > { %v611_v17 = vadd.f32 %v610_v16, %v609_v13 }
 0x114   : > { %v624_v29 = vadd.f32 %v623_v14, %v622_v6 }
 0x115   : > { %v612_v18 = vrot.slane %v611_v17, 2 }
 0x116   : > { %v625_v19 = vrot.slane %v624_v29, 2 }
 0x117   : > { %v613_v23 = vadd.f32 %v612_v18, %v611_v17 }
 0x118   : > { %v626_v31 = vadd.f32 %v625_v19, %v624_v29 }
 0x119   : > { %v614_v24 = vrot.slane %v613_v23, 1 }
 0x11a   : > { %v627_v21 = vrot.slane %v626_v31, 1 }
 0x11b   : > { %v615_v30 = vadd.f32 %v614_v24, %v613_v23 }
 0x11c   : > { %v628_v25 = vadd.f32 %v627_v21, %v626_v31 }
 0x11e   : > { %v631_v26 = vcombine.low %v615_v30, %v628_v25 }
 0x120   : > { %v638_v22 = vrot.slane %v631_v26, %v1245_v20 }
 0x122   : > { %v645_v32 = vrot.slane %v638_v22, %v1245_v20 }
 0x124   : > { %651 = vst.msk [vmem:[%s1252_s27] ss:$2 sm:$0x3] %vm1255_vm7, %v645_v32 }
 0x125 PF: > { %s15_s20 = sadd.s32 1, %s995_s20   ;;  %s1321_s18 = smov %s991_s19 }
 0x126   : > { %p12_p5 = scmp.ge.s32.totalorder %s15_s20, 4   ;;  %s1322_s19 = smov %s1324_s21 }
 0x128   :  { %14 = sbr.rel (!%p12_p5) target bundleno = 2 (0x2), region = 77 }

</bundles_post_ra>
